<compile_context>
chip_gen: v7x
topology: tpu7x:2x2x1
jax: 0.10.0
libtpu: 0.0.40
codegen_flags: <defaults>
</compile_context>

<pallas_src>
import functools
import math

import jax
import jax.numpy as jnp
from jax.experimental import pallas as pl
from jax.experimental.pallas import tpu as pltpu

# ---- model hyper-parameters (small synthetic sizes) -------------------------
EMB = 32          # emb_size
N_NODE = 16       # n_node
BATCH = 4         # batch_size
SEQ_LEN = 8       # max session length
LAYERS = 2        # number of (hyper/line) conv layers
BETA = 0.01       # self.beta
USE_HG = True     # self.use_HG

# ---- packed-slab row offsets -------------------------------------------------
_R_ADJ = 0                       # adjacency (N rows, first N cols valid)
_R_EMB = _R_ADJ + N_NODE         # embedding (N, E)
_R_POS = _R_EMB + N_NODE         # tiled positional embedding (B*L, E)
_R_W1 = _R_POS + BATCH * SEQ_LEN  # w_1 (2E, E)
_R_GLU = _R_W1 + 2 * EMB         # [glu1_w^T ; glu2_w^T] (2E, E)
_R_PCT = _R_GLU + 2 * EMB        # pcol^T (E, E)
_R_VEC = _R_PCT + EMB            # row 0: glu1_b, row 1: w_2^T, rows 2:2+B: prow
PARAM_ROWS = _R_VEC + 8          # = 232
DYN_ROWS = BATCH * SEQ_LEN + 8   # = 40 (mask rows + batch row block + pad)
OUT_ROWS = N_NODE + 2 * BATCH + 1  # = 25 (item_hg ; sess_hg ; sess_lg ; loss)

VMEM_SPEC = pl.BlockSpec(memory_space=pltpu.MemorySpace.VMEM)


# -----------------------------------------------------------------------------
# Fused DHCN forward kernel
# -----------------------------------------------------------------------------
def dhcn_kernel(p_ref, d_ref, idx_ref, out_ref, *, layers):
    f32 = jnp.float32
    B, L, N, E = BATCH, SEQ_LEN, N_NODE, EMB
    BL = B * L

    # ---- static slab views (zero-cost slices of the packed inputs) ----------
    adj = p_ref[_R_ADJ:_R_ADJ + N, 0:N]                   # (N, N)
    emb0 = p_ref[_R_EMB:_R_EMB + N, :]                    # (N, E)
    pos_emb = p_ref[_R_POS:_R_POS + BL, :]                # (BL, E)
    w1_pos = p_ref[_R_W1:_R_W1 + E, :]                    # (E, E)
    w1_seq = p_ref[_R_W1 + E:_R_W1 + 2 * E, :]            # (E, E)
    glu1_wT = p_ref[_R_GLU:_R_GLU + E, :]                 # (E, E)
    glu2_wT = p_ref[_R_GLU + E:_R_GLU + 2 * E, :]         # (E, E)
    pcol_t = p_ref[_R_PCT:_R_PCT + E, :]                  # (E, E)
    glu1_b = p_ref[_R_VEC:_R_VEC + 1, :]                  # (1, E)
    w2_row = p_ref[_R_VEC + 1:_R_VEC + 2, :]              # (1, E)
    prow = p_ref[_R_VEC + 2:_R_VEC + 2 + B, 0:B]          # (B, B)
    mask = d_ref[0:BL, 0:1]                               # (BL, 1)
    sess_len = d_ref[BL:BL + B, 0:1]                      # (B, 1)
    d_diag = d_ref[BL:BL + B, 1:2]                        # (B, 1)
    a_mat = d_ref[BL:BL + B, 4:4 + B]                     # (B, B)

    # ---- HyperConv: item_hg = sum_{k<=layers} adjacency^k @ embedding -------
    # (reference sums the per-layer outputs: np.sum(final, 0))
    cur = emb0
    item_hg = emb0
    for _ in range(layers):
        cur = jnp.dot(adj, cur, preferred_element_type=f32)
        item_hg = item_hg + cur

    # ---- fused gather: [seq_h ; seq_h1] in ONE block-diagonal matmul --------
    # rows 0:BL gather reversed ids out of item_hg (cols 0:N), rows BL:2BL
    # gather raw ids (pre-shifted by N in the wrapper) out of the layer-0
    # embedding (cols N:2N); id 0 is padding and matches no column -> zero row
    # (equivalent to the reference's prepended zeros row).
    idx = idx_ref[...]                                          # (2BL, 1) i32
    col2n = jax.lax.broadcasted_iota(jnp.int32, (2 * BL, 2 * N), 1)
    onehot = jnp.where((idx - 1) == col2n, 1.0, 0.0)            # (2BL, 2N)
    stacked = jnp.concatenate([item_hg, emb0], axis=0)          # (2N, E)
    seq_all = jnp.dot(onehot, stacked, preferred_element_type=f32)  # (2BL, E)
    seq_h = seq_all[0:BL]                                       # (BL, E)

    # ---- fused per-session sums (hs and the LineConv mean) ------------------
    # seg2[i, j] = (j // L == i); in-kernel iota compare, no DMA, no division.
    rr = jax.lax.broadcasted_iota(jnp.int32, (2 * B, 2 * BL), 0)
    cc = jax.lax.broadcasted_iota(jnp.int32, (2 * B, 2 * BL), 1)
    lo = rr * L
    seg2 = jnp.where((cc >= lo) & (cc < lo + L), 1.0, 0.0)      # (2B, 2BL)
    sums = jnp.dot(seg2, seq_all, preferred_element_type=f32)   # (2B, E)
    inv_len = 1.0 / jnp.maximum(sess_len, 1.0)                  # exact divide
    hs = sums[0:B] * inv_len                                    # (B, E)
    s = sums[B:2 * B] * inv_len                                 # (B, E)

    # ---- soft-attention session embedding (generate_sess_emb) ---------------
    # broadcast hs per sequence position first so the two gate matmuls below
    # are independent (shorter MXU dependency chain).
    rt = jax.lax.broadcasted_iota(jnp.int32, (BL, B), 0)
    ct = jax.lax.broadcasted_iota(jnp.int32, (BL, B), 1)
    lo_t = ct * L
    seg_t = jnp.where((rt >= lo_t) & (rt < lo_t + L), 1.0, 0.0)  # (BL, B)
    hs_b = jnp.dot(seg_t, hs, preferred_element_type=f32)        # (BL, E)

    nh = jnp.tanh(
        jnp.dot(pos_emb, w1_pos, preferred_element_type=f32)
        + jnp.dot(seq_h, w1_seq, preferred_element_type=f32))    # (BL, E)
    gate = jax.nn.sigmoid(
        jnp.dot(nh, glu1_wT, preferred_element_type=f32)
        + jnp.dot(hs_b, glu2_wT, preferred_element_type=f32)
        + glu1_b)                                                # (BL, E)
    # beta = gate @ w_2 with a 1-wide RHS -> lane reduction, not an MXU matmul
    beta = jnp.sum(gate * w2_row, axis=-1, keepdims=True) * mask  # (BL, 1)
    seg = seg2[0:B, 0:BL]                                        # (B, BL)
    sess_hg = jnp.dot(seg, beta * seq_h, preferred_element_type=f32)  # (B, E)

    # ---- LineConv: layered propagation; DA = diag(D) * A on the VPU ---------
    da = d_diag * a_mat                                          # (B, B)
    sess_lg = s
    cur_s = s
    for _ in range(layers):
        cur_s = jnp.dot(da, cur_s, preferred_element_type=f32)
        sess_lg = sess_lg + cur_s

    # ---- SSL contrastive loss (fixed permutation; see TODO in __main__) -----
    # neg = rowsum((prow @ hg) * (lg @ pcol^T)) == rowsum(lg * (prow@hg@pcol));
    # the two permutation matmuls are independent.
    hg_row = jnp.dot(prow, sess_hg, preferred_element_type=f32)   # (B, E)
    lg_col = jnp.dot(sess_lg, pcol_t, preferred_element_type=f32)  # (B, E)
    pos_s = jnp.sum(sess_hg * sess_lg, axis=-1, keepdims=True)    # (B, 1)
    neg_s = jnp.sum(hg_row * lg_col, axis=-1, keepdims=True)      # (B, 1)
    term = (-jnp.log(1e-8 + jax.nn.sigmoid(pos_s))
            - jnp.log(1e-8 + (1.0 - jax.nn.sigmoid(neg_s))))
    loss_row = jnp.sum(term, axis=0, keepdims=True)               # (1, 1)

    # ---- single packed output slab -------------------------------------------
    out_ref[0:N, :] = item_hg
    out_ref[N:N + B, :] = sess_hg
    out_ref[N + B:N + 2 * B, :] = sess_lg
    out_ref[N + 2 * B:N + 2 * B + 1, :] = jnp.broadcast_to(loss_row, (1, E))


# -----------------------------------------------------------------------------
# Parameter-slab builder (runs once at init time, mirrors DHCN.__init__)
# -----------------------------------------------------------------------------
def build_param_slab(adjacency, embedding, pos_embedding, w_1, w_2,
                     glu1_w, glu1_b, glu2_w, prow, pcol_t):
    f32 = jnp.float32
    # adjacency padded to E columns so every slab row has the same width
    adj_pad = jnp.zeros((N_NODE, EMB), f32).at[:, :N_NODE].set(adjacency)
    pos_tiled = jnp.tile(pos_embedding[:SEQ_LEN], (BATCH, 1))       # (B*L, E)
    glu_stack = jnp.concatenate([glu1_w.T, glu2_w.T], axis=0)       # (2E, E)
    vec_block = jnp.zeros((8, EMB), f32)
    vec_block = vec_block.at[0].set(glu1_b)                         # glu1 bias
    vec_block = vec_block.at[1].set(w_2[:, 0])                      # w_2 row
    vec_block = vec_block.at[2:2 + BATCH, :BATCH].set(prow)         # SSL perm
    slab = jnp.concatenate(
        [adj_pad, embedding, pos_tiled, w_1, glu_stack, pcol_t, vec_block],
        axis=0)
    assert slab.shape == (PARAM_ROWS, EMB)
    return slab


# -----------------------------------------------------------------------------
# DHCN forward wrapper (only trivial packing / dtype casts in XLA glue)
# -----------------------------------------------------------------------------
def dhcn_forward(kp, session_item, session_len, D, A, reversed_sess_item, mask):
    f32 = jnp.float32
    B, L = session_item.shape

    # ---- pack the per-call integer indices into one (2BL, 1) i32 slab -------
    rev_idx = reversed_sess_item.reshape(B * L, 1).astype(jnp.int32)
    item_idx = session_item.reshape(B * L, 1).astype(jnp.int32)
    item_shift = jnp.where(item_idx > 0, item_idx + N_NODE, 0)   # 0 stays padding
    idx_slab = jnp.concatenate([rev_idx, item_shift], axis=0)    # (2BL, 1)

    # ---- pack the per-call float data into one (40, E) f32 slab -------------
    mask_rows = jnp.pad(mask.astype(f32).reshape(B * L, 1),
                        ((0, 0), (0, EMB - 1)))                   # (BL, E)
    # D is DHCN's diagonal session-degree matrix: pass only its diagonal so
    # the kernel uses a VPU multiply instead of a 4x4 MXU matmul.
    d_diag = jnp.diagonal(D).reshape(B, 1).astype(f32)
    batch_rows = jnp.concatenate(
        [session_len.reshape(B, 1).astype(f32), d_diag,
         jnp.zeros((B, 2), f32), A.astype(f32),
         jnp.zeros((B, EMB - (4 + B)), f32)], axis=1)             # (B, E)
    dyn_slab = jnp.concatenate(
        [mask_rows, batch_rows,
         jnp.zeros((DYN_ROWS - B * L - B, EMB), f32)], axis=0)    # (40, E)

    out = pl.pallas_call(
        functools.partial(dhcn_kernel, layers=LAYERS),
        out_shape=jax.ShapeDtypeStruct((OUT_ROWS, EMB), jnp.float32),
        in_specs=[VMEM_SPEC, VMEM_SPEC, VMEM_SPEC],
        out_specs=VMEM_SPEC,
    )(kp["param_slab"], dyn_slab, idx_slab)

    item_embeddings_hg = out[0:N_NODE]
    sess_hg = out[N_NODE:N_NODE + BATCH]
    sess_lg = out[N_NODE + BATCH:N_NODE + 2 * BATCH]
    con_loss = out[N_NODE + 2 * BATCH, 0]
    sess_emb = sess_hg if USE_HG else sess_lg
    return item_embeddings_hg, sess_emb, BETA * con_loss


# -----------------------------------------------------------------------------
if __name__ == "__main__":
    key = jax.random.PRNGKey(0)
    keys = jax.random.split(key, 10)
    stdv = 1.0 / math.sqrt(EMB)

    # DHCN.init_parameters(): every parameter ~ U(-stdv, stdv)
    embedding = jax.random.uniform(keys[0], (N_NODE, EMB), jnp.float32, -stdv, stdv)
    pos_embedding = jax.random.uniform(keys[1], (200, EMB), jnp.float32, -stdv, stdv)
    w_1 = jax.random.uniform(keys[2], (2 * EMB, EMB), jnp.float32, -stdv, stdv)
    w_2 = jax.random.uniform(keys[3], (EMB, 1), jnp.float32, -stdv, stdv)
    glu1_w = jax.random.uniform(keys[4], (EMB, EMB), jnp.float32, -stdv, stdv)
    glu1_b = jax.random.uniform(keys[5], (EMB,), jnp.float32, -stdv, stdv)
    glu2_w = jax.random.uniform(keys[6], (EMB, EMB), jnp.float32, -stdv, stdv)

    # dense stand-in for the scipy.sparse COO adjacency (n_node x n_node)
    adjacency = jax.random.uniform(keys[7], (N_NODE, N_NODE), jnp.float32) / N_NODE

    # TODO(synk): torch.randperm has no in-kernel equivalent; deterministic
    # fixed-key permutation matrices stand in for the SSL row/column shuffle.
    row_perm = jax.random.permutation(jax.random.PRNGKey(1), BATCH)
    col_perm = jax.random.permutation(jax.random.PRNGKey(2), EMB)
    prow = jax.nn.one_hot(row_perm, BATCH, dtype=jnp.float32)        # (B, B)
    pcol_t = jax.nn.one_hot(col_perm, EMB, dtype=jnp.float32)        # (E, E) = pcol^T

    kparams = {
        "param_slab": build_param_slab(adjacency, embedding, pos_embedding,
                                       w_1, w_2, glu1_w, glu1_b, glu2_w,
                                       prow, pcol_t),
    }

    # synthetic session batch: item ids in [1, N_NODE], 0 = padding
    session_item = jax.random.randint(keys[8], (BATCH, SEQ_LEN), 1, N_NODE + 1)
    lens = jnp.array([SEQ_LEN, SEQ_LEN - 2, SEQ_LEN - 3, SEQ_LEN - 5], jnp.int32)
    pos_idx = jnp.arange(SEQ_LEN)[None, :]
    mask = (pos_idx < lens[:, None]).astype(jnp.int32)
    session_item = session_item * mask

    rev_pos = lens[:, None] - 1 - pos_idx
    reversed_sess_item = jnp.where(
        rev_pos >= 0,
        jnp.take_along_axis(session_item, jnp.clip(rev_pos, 0, SEQ_LEN - 1), axis=1),
        0)
    session_len = lens.astype(jnp.float32)[:, None]                  # (B, 1)

    D = jnp.diag(jnp.full((BATCH,), 1.0 / BATCH, jnp.float32))       # degree stand-in
    A = jax.random.uniform(keys[9], (BATCH, BATCH), jnp.float32)

    fwd = jax.jit(dhcn_forward)
    item_embeddings_hg, sess_emb, con_loss = fwd(
        kparams, session_item, session_len, D, A, reversed_sess_item, mask)
    jax.block_until_ready((item_embeddings_hg, sess_emb, con_loss))

    assert item_embeddings_hg.shape == (N_NODE, EMB)
    assert sess_emb.shape == (BATCH, EMB)
    assert con_loss.shape == ()
    assert bool(jnp.all(jnp.isfinite(item_embeddings_hg)))
    assert bool(jnp.all(jnp.isfinite(sess_emb)))
    assert bool(jnp.isfinite(con_loss))
    print("KERNEL_OK")
</pallas_src>

<mosaic_0001>
module attributes {stable_mosaic.version = 11 : i64} {
  func.func @dhcn_kernel(%arg0: memref<232x32xf32, #tpu.memory_space<vmem>>, %arg1: memref<40x32xf32, #tpu.memory_space<vmem>>, %arg2: memref<64x1xi32, #tpu.memory_space<vmem>>, %arg3: memref<25x32xf32, #tpu.memory_space<vmem>>) attributes {dimension_semantics = [], scalar_prefetch = 0 : i64, scratch_operands = 0 : i64, tpu.core_type = #tpu.core_type<tc>} {
    %c0 = arith.constant 0 : index
    %c0_0 = arith.constant 0 : index
    %0 = vector.load %arg0[%c0, %c0_0] : memref<232x32xf32, #tpu.memory_space<vmem>>, vector<16x16xf32>
    %c16 = arith.constant 16 : index
    %c0_1 = arith.constant 0 : index
    %1 = vector.load %arg0[%c16, %c0_1] : memref<232x32xf32, #tpu.memory_space<vmem>>, vector<16x32xf32>
    %c32 = arith.constant 32 : index
    %c0_2 = arith.constant 0 : index
    %2 = vector.load %arg0[%c32, %c0_2] : memref<232x32xf32, #tpu.memory_space<vmem>>, vector<32x32xf32>
    %c64 = arith.constant 64 : index
    %c0_3 = arith.constant 0 : index
    %3 = vector.load %arg0[%c64, %c0_3] : memref<232x32xf32, #tpu.memory_space<vmem>>, vector<32x32xf32>
    %c96 = arith.constant 96 : index
    %c0_4 = arith.constant 0 : index
    %4 = vector.load %arg0[%c96, %c0_4] : memref<232x32xf32, #tpu.memory_space<vmem>>, vector<32x32xf32>
    %c128 = arith.constant 128 : index
    %c0_5 = arith.constant 0 : index
    %5 = vector.load %arg0[%c128, %c0_5] : memref<232x32xf32, #tpu.memory_space<vmem>>, vector<32x32xf32>
    %c160 = arith.constant 160 : index
    %c0_6 = arith.constant 0 : index
    %6 = vector.load %arg0[%c160, %c0_6] : memref<232x32xf32, #tpu.memory_space<vmem>>, vector<32x32xf32>
    %c192 = arith.constant 192 : index
    %c0_7 = arith.constant 0 : index
    %7 = vector.load %arg0[%c192, %c0_7] : memref<232x32xf32, #tpu.memory_space<vmem>>, vector<32x32xf32>
    %c224 = arith.constant 224 : index
    %c0_8 = arith.constant 0 : index
    %8 = vector.load %arg0[%c224, %c0_8] : memref<232x32xf32, #tpu.memory_space<vmem>>, vector<1x32xf32>
    %c225 = arith.constant 225 : index
    %c0_9 = arith.constant 0 : index
    %9 = vector.load %arg0[%c225, %c0_9] : memref<232x32xf32, #tpu.memory_space<vmem>>, vector<1x32xf32>
    %c226 = arith.constant 226 : index
    %c0_10 = arith.constant 0 : index
    %10 = vector.load %arg0[%c226, %c0_10] : memref<232x32xf32, #tpu.memory_space<vmem>>, vector<4x4xf32>
    %c0_11 = arith.constant 0 : index
    %c0_12 = arith.constant 0 : index
    %11 = vector.load %arg1[%c0_11, %c0_12] : memref<40x32xf32, #tpu.memory_space<vmem>>, vector<32x1xf32>
    %c32_13 = arith.constant 32 : index
    %c0_14 = arith.constant 0 : index
    %12 = vector.load %arg1[%c32_13, %c0_14] : memref<40x32xf32, #tpu.memory_space<vmem>>, vector<4x1xf32>
    %c32_15 = arith.constant 32 : index
    %c1 = arith.constant 1 : index
    %13 = vector.load %arg1[%c32_15, %c1] : memref<40x32xf32, #tpu.memory_space<vmem>>, vector<4x1xf32>
    %c32_16 = arith.constant 32 : index
    %c4 = arith.constant 4 : index
    %14 = vector.load %arg1[%c32_16, %c4] : memref<40x32xf32, #tpu.memory_space<vmem>>, vector<4x4xf32>
    %cst = arith.constant dense<0.000000e+00> : vector<16x32xf32>
    %15 = tpu.matmul %0, %1, %cst {dimension_numbers = #tpu.dot_dimension_numbers<[1], [0], [0], [1], [0, 0, 1, 1], [], []>} : vector<16x16xf32>, vector<16x32xf32>, vector<16x32xf32> -> vector<16x32xf32>
    %16 = arith.addf %1, %15 : vector<16x32xf32>
    %cst_17 = arith.constant dense<0.000000e+00> : vector<16x32xf32>
    %17 = tpu.matmul %0, %15, %cst_17 {dimension_numbers = #tpu.dot_dimension_numbers<[1], [0], [0], [1], [0, 0, 1, 1], [], []>} : vector<16x16xf32>, vector<16x32xf32>, vector<16x32xf32> -> vector<16x32xf32>
    %18 = arith.addf %16, %17 : vector<16x32xf32>
    %c0_18 = arith.constant 0 : index
    %c0_19 = arith.constant 0 : index
    %19 = vector.load %arg2[%c0_18, %c0_19] : memref<64x1xi32, #tpu.memory_space<vmem>>, vector<64x1xi32>
    %20 = tpu.iota {dimensions = array<i32: 1>} : vector<64x32xi32>
    %c1_i32 = arith.constant 1 : i32
    %21 = vector.broadcast %c1_i32 : i32 to vector<64x1xi32>
    %22 = arith.subi %19, %21 : vector<64x1xi32>
    %23 = vector.broadcast %22 : vector<64x1xi32> to vector<64x32xi32>
    %24 = arith.cmpi eq, %23, %20 : vector<64x32xi32>
    %cst_20 = arith.constant 1.000000e+00 : f32
    %cst_21 = arith.constant 0.000000e+00 : f32
    %25 = vector.broadcast %cst_20 : f32 to vector<64x32xf32>
    %26 = vector.broadcast %cst_21 : f32 to vector<64x32xf32>
    %27 = arith.select %24, %25, %26 : vector<64x32xi1>, vector<64x32xf32>
    %28 = tpu.concatenate %18, %1 in 0 : vector<16x32xf32>, vector<16x32xf32> -> vector<32x32xf32>
    %cst_22 = arith.constant dense<0.000000e+00> : vector<64x32xf32>
    %29 = tpu.matmul %27, %28, %cst_22 {dimension_numbers = #tpu.dot_dimension_numbers<[1], [0], [0], [1], [0, 0, 1, 1], [], []>} : vector<64x32xf32>, vector<32x32xf32>, vector<64x32xf32> -> vector<64x32xf32>
    %30 = vector.extract_strided_slice %29 {offsets = [0, 0], sizes = [32, 32], strides = [1, 1]} : vector<64x32xf32> to vector<32x32xf32>
    %31 = tpu.iota {dimensions = array<i32: 0>} : vector<8x64xi32>
    %32 = tpu.iota {dimensions = array<i32: 1>} : vector<8x64xi32>
    %c8_i32 = arith.constant 8 : i32
    %33 = vector.broadcast %c8_i32 : i32 to vector<8x64xi32>
    %34 = arith.muli %31, %33 : vector<8x64xi32>
    %35 = arith.cmpi sge, %32, %34 : vector<8x64xi32>
    %c8_i32_23 = arith.constant 8 : i32
    %36 = vector.broadcast %c8_i32_23 : i32 to vector<8x64xi32>
    %37 = arith.addi %34, %36 : vector<8x64xi32>
    %38 = arith.cmpi slt, %32, %37 : vector<8x64xi32>
    %39 = arith.andi %35, %38 : vector<8x64xi1>
    %cst_24 = arith.constant 1.000000e+00 : f32
    %cst_25 = arith.constant 0.000000e+00 : f32
    %40 = vector.broadcast %cst_24 : f32 to vector<8x64xf32>
    %41 = vector.broadcast %cst_25 : f32 to vector<8x64xf32>
    %42 = arith.select %39, %40, %41 : vector<8x64xi1>, vector<8x64xf32>
    %cst_26 = arith.constant dense<0.000000e+00> : vector<8x32xf32>
    %43 = tpu.matmul %42, %29, %cst_26 {dimension_numbers = #tpu.dot_dimension_numbers<[1], [0], [0], [1], [0, 0, 1, 1], [], []>} : vector<8x64xf32>, vector<64x32xf32>, vector<8x32xf32> -> vector<8x32xf32>
    %cst_27 = arith.constant 1.000000e+00 : f32
    %44 = vector.broadcast %cst_27 : f32 to vector<4x1xf32>
    %45 = arith.maximumf %12, %44 : vector<4x1xf32>
    %cst_28 = arith.constant 1.000000e+00 : f32
    %46 = vector.broadcast %cst_28 : f32 to vector<4x1xf32>
    %47 = arith.divf %46, %45 : vector<4x1xf32>
    %48 = vector.extract_strided_slice %43 {offsets = [0, 0], sizes = [4, 32], strides = [1, 1]} : vector<8x32xf32> to vector<4x32xf32>
    %49 = vector.broadcast %47 : vector<4x1xf32> to vector<4x32xf32>
    %50 = arith.mulf %48, %49 : vector<4x32xf32>
    %51 = vector.extract_strided_slice %43 {offsets = [4, 0], sizes = [4, 32], strides = [1, 1]} : vector<8x32xf32> to vector<4x32xf32>
    %52 = vector.broadcast %47 : vector<4x1xf32> to vector<4x32xf32>
    %53 = arith.mulf %51, %52 : vector<4x32xf32>
    %54 = tpu.iota {dimensions = array<i32: 0>} : vector<32x4xi32>
    %55 = tpu.iota {dimensions = array<i32: 1>} : vector<32x4xi32>
    %c8_i32_29 = arith.constant 8 : i32
    %56 = vector.broadcast %c8_i32_29 : i32 to vector<32x4xi32>
    %57 = arith.muli %55, %56 : vector<32x4xi32>
    %58 = arith.cmpi sge, %54, %57 : vector<32x4xi32>
    %c8_i32_30 = arith.constant 8 : i32
    %59 = vector.broadcast %c8_i32_30 : i32 to vector<32x4xi32>
    %60 = arith.addi %57, %59 : vector<32x4xi32>
    %61 = arith.cmpi slt, %54, %60 : vector<32x4xi32>
    %62 = arith.andi %58, %61 : vector<32x4xi1>
    %cst_31 = arith.constant 1.000000e+00 : f32
    %cst_32 = arith.constant 0.000000e+00 : f32
    %63 = vector.broadcast %cst_31 : f32 to vector<32x4xf32>
    %64 = vector.broadcast %cst_32 : f32 to vector<32x4xf32>
    %65 = arith.select %62, %63, %64 : vector<32x4xi1>, vector<32x4xf32>
    %cst_33 = arith.constant dense<0.000000e+00> : vector<32x32xf32>
    %66 = tpu.matmul %65, %50, %cst_33 {dimension_numbers = #tpu.dot_dimension_numbers<[1], [0], [0], [1], [0, 0, 1, 1], [], []>} : vector<32x4xf32>, vector<4x32xf32>, vector<32x32xf32> -> vector<32x32xf32>
    %cst_34 = arith.constant dense<0.000000e+00> : vector<32x32xf32>
    %67 = tpu.matmul %2, %3, %cst_34 {dimension_numbers = #tpu.dot_dimension_numbers<[1], [0], [0], [1], [0, 0, 1, 1], [], []>} : vector<32x32xf32>, vector<32x32xf32>, vector<32x32xf32> -> vector<32x32xf32>
    %cst_35 = arith.constant dense<0.000000e+00> : vector<32x32xf32>
    %68 = tpu.matmul %30, %4, %cst_35 {dimension_numbers = #tpu.dot_dimension_numbers<[1], [0], [0], [1], [0, 0, 1, 1], [], []>} : vector<32x32xf32>, vector<32x32xf32>, vector<32x32xf32> -> vector<32x32xf32>
    %69 = arith.addf %67, %68 : vector<32x32xf32>
    %70 = math.tanh %69 : vector<32x32xf32>
    %cst_36 = arith.constant dense<0.000000e+00> : vector<32x32xf32>
    %71 = tpu.matmul %70, %5, %cst_36 {dimension_numbers = #tpu.dot_dimension_numbers<[1], [0], [0], [1], [0, 0, 1, 1], [], []>} : vector<32x32xf32>, vector<32x32xf32>, vector<32x32xf32> -> vector<32x32xf32>
    %cst_37 = arith.constant dense<0.000000e+00> : vector<32x32xf32>
    %72 = tpu.matmul %66, %6, %cst_37 {dimension_numbers = #tpu.dot_dimension_numbers<[1], [0], [0], [1], [0, 0, 1, 1], [], []>} : vector<32x32xf32>, vector<32x32xf32>, vector<32x32xf32> -> vector<32x32xf32>
    %73 = arith.addf %71, %72 : vector<32x32xf32>
    %74 = vector.broadcast %8 : vector<1x32xf32> to vector<32x32xf32>
    %75 = arith.addf %73, %74 : vector<32x32xf32>
    %76 = arith.negf %75 : vector<32x32xf32>
    %77 = math.exp %76 : vector<32x32xf32>
    %cst_38 = arith.constant 1.000000e+00 : f32
    %78 = vector.broadcast %cst_38 : f32 to vector<32x32xf32>
    %79 = arith.addf %78, %77 : vector<32x32xf32>
    %80 = arith.divf %78, %79 : vector<32x32xf32>
    %81 = vector.broadcast %9 : vector<1x32xf32> to vector<32x32xf32>
    %82 = arith.mulf %80, %81 : vector<32x32xf32>
    %cst_39 = arith.constant dense<0.000000e+00> : vector<32xf32>
    %83 = vector.multi_reduction <add>, %82, %cst_39 [1] : vector<32x32xf32> to vector<32xf32>
    %84 = vector.shape_cast %83 : vector<32xf32> to vector<32x1xf32>
    %85 = arith.mulf %84, %11 : vector<32x1xf32>
    %86 = vector.extract_strided_slice %42 {offsets = [0, 0], sizes = [4, 32], strides = [1, 1]} : vector<8x64xf32> to vector<4x32xf32>
    %87 = vector.broadcast %85 : vector<32x1xf32> to vector<32x32xf32>
    %88 = arith.mulf %87, %30 : vector<32x32xf32>
    %cst_40 = arith.constant dense<0.000000e+00> : vector<4x32xf32>
    %89 = tpu.matmul %86, %88, %cst_40 {dimension_numbers = #tpu.dot_dimension_numbers<[1], [0], [0], [1], [0, 0, 1, 1], [], []>} : vector<4x32xf32>, vector<32x32xf32>, vector<4x32xf32> -> vector<4x32xf32>
    %90 = vector.broadcast %13 : vector<4x1xf32> to vector<4x4xf32>
    %91 = arith.mulf %90, %14 : vector<4x4xf32>
    %cst_41 = arith.constant dense<0.000000e+00> : vector<4x32xf32>
    %92 = tpu.matmul %91, %53, %cst_41 {dimension_numbers = #tpu.dot_dimension_numbers<[1], [0], [0], [1], [0, 0, 1, 1], [], []>} : vector<4x4xf32>, vector<4x32xf32>, vector<4x32xf32> -> vector<4x32xf32>
    %93 = arith.addf %53, %92 : vector<4x32xf32>
    %cst_42 = arith.constant dense<0.000000e+00> : vector<4x32xf32>
    %94 = tpu.matmul %91, %92, %cst_42 {dimension_numbers = #tpu.dot_dimension_numbers<[1], [0], [0], [1], [0, 0, 1, 1], [], []>} : vector<4x4xf32>, vector<4x32xf32>, vector<4x32xf32> -> vector<4x32xf32>
    %95 = arith.addf %93, %94 : vector<4x32xf32>
    %cst_43 = arith.constant dense<0.000000e+00> : vector<4x32xf32>
    %96 = tpu.matmul %10, %89, %cst_43 {dimension_numbers = #tpu.dot_dimension_numbers<[1], [0], [0], [1], [0, 0, 1, 1], [], []>} : vector<4x4xf32>, vector<4x32xf32>, vector<4x32xf32> -> vector<4x32xf32>
    %cst_44 = arith.constant dense<0.000000e+00> : vector<4x32xf32>
    %97 = tpu.matmul %95, %7, %cst_44 {dimension_numbers = #tpu.dot_dimension_numbers<[1], [0], [0], [1], [0, 0, 1, 1], [], []>} : vector<4x32xf32>, vector<32x32xf32>, vector<4x32xf32> -> vector<4x32xf32>
    %98 = arith.mulf %89, %95 : vector<4x32xf32>
    %cst_45 = arith.constant dense<0.000000e+00> : vector<4xf32>
    %99 = vector.multi_reduction <add>, %98, %cst_45 [1] : vector<4x32xf32> to vector<4xf32>
    %100 = vector.shape_cast %99 : vector<4xf32> to vector<4x1xf32>
    %101 = arith.mulf %96, %97 : vector<4x32xf32>
    %cst_46 = arith.constant dense<0.000000e+00> : vector<4xf32>
    %102 = vector.multi_reduction <add>, %101, %cst_46 [1] : vector<4x32xf32> to vector<4xf32>
    %103 = vector.shape_cast %102 : vector<4xf32> to vector<4x1xf32>
    %104 = arith.negf %100 : vector<4x1xf32>
    %105 = math.exp %104 : vector<4x1xf32>
    %cst_47 = arith.constant 1.000000e+00 : f32
    %106 = vector.broadcast %cst_47 : f32 to vector<4x1xf32>
    %107 = arith.addf %106, %105 : vector<4x1xf32>
    %108 = arith.divf %106, %107 : vector<4x1xf32>
    %cst_48 = arith.constant 9.99999993E-9 : f32
    %109 = vector.broadcast %cst_48 : f32 to vector<4x1xf32>
    %110 = arith.addf %109, %108 : vector<4x1xf32>
    %111 = math.log %110 : vector<4x1xf32>
    %cst_49 = arith.constant 0.000000e+00 : f32
    %112 = vector.broadcast %cst_49 : f32 to vector<4x1xf32>
    %113 = arith.subf %112, %111 : vector<4x1xf32>
    %114 = arith.negf %103 : vector<4x1xf32>
    %115 = math.exp %114 : vector<4x1xf32>
    %cst_50 = arith.constant 1.000000e+00 : f32
    %116 = vector.broadcast %cst_50 : f32 to vector<4x1xf32>
    %117 = arith.addf %116, %115 : vector<4x1xf32>
    %118 = arith.divf %116, %117 : vector<4x1xf32>
    %cst_51 = arith.constant 1.000000e+00 : f32
    %119 = vector.broadcast %cst_51 : f32 to vector<4x1xf32>
    %120 = arith.subf %119, %118 : vector<4x1xf32>
    %cst_52 = arith.constant 9.99999993E-9 : f32
    %121 = vector.broadcast %cst_52 : f32 to vector<4x1xf32>
    %122 = arith.addf %121, %120 : vector<4x1xf32>
    %123 = math.log %122 : vector<4x1xf32>
    %124 = arith.subf %113, %123 : vector<4x1xf32>
    %cst_53 = arith.constant dense<0.000000e+00> : vector<1xf32>
    %125 = vector.multi_reduction <add>, %124, %cst_53 [0] : vector<4x1xf32> to vector<1xf32>
    %126 = vector.shape_cast %125 : vector<1xf32> to vector<1x1xf32>
    %c0_54 = arith.constant 0 : index
    %c0_55 = arith.constant 0 : index
    %127 = vector.load %arg3[%c0_54, %c0_55] : memref<25x32xf32, #tpu.memory_space<vmem>>, vector<16x32xf32>
    tpu.vector_store %arg3[%c0_54, %c0_55], %18 {strides = array<i32>} : memref<25x32xf32, #tpu.memory_space<vmem>>, vector<16x32xf32>,
    %c16_56 = arith.constant 16 : index
    %c0_57 = arith.constant 0 : index
    %128 = vector.load %arg3[%c16_56, %c0_57] : memref<25x32xf32, #tpu.memory_space<vmem>>, vector<4x32xf32>
    tpu.vector_store %arg3[%c16_56, %c0_57], %89 {strides = array<i32>} : memref<25x32xf32, #tpu.memory_space<vmem>>, vector<4x32xf32>,
    %c20 = arith.constant 20 : index
    %c0_58 = arith.constant 0 : index
    %129 = vector.load %arg3[%c20, %c0_58] : memref<25x32xf32, #tpu.memory_space<vmem>>, vector<4x32xf32>
    tpu.vector_store %arg3[%c20, %c0_58], %95 {strides = array<i32>} : memref<25x32xf32, #tpu.memory_space<vmem>>, vector<4x32xf32>,
    %130 = vector.shape_cast %126 : vector<1x1xf32> to vector<1x1xf32>
    %131 = vector.broadcast %130 : vector<1x1xf32> to vector<1x32xf32>
    %c24 = arith.constant 24 : index
    %c0_59 = arith.constant 0 : index
    %132 = vector.load %arg3[%c24, %c0_59] : memref<25x32xf32, #tpu.memory_space<vmem>>, vector<1x32xf32>
    tpu.vector_store %arg3[%c24, %c0_59], %131 {strides = array<i32>} : memref<25x32xf32, #tpu.memory_space<vmem>>, vector<1x32xf32>,
    return
  }
}

</mosaic_0001>

<bundles_post_ra>
// kernel: dhcn_forward.1
= control target key start
LH: loop header
LB: loop body
LE: loop exit
PB: predicated region body
PF: predicated region fallthrough
CT: control target
= control target key end

     0   :  { %vm50_vm0 = vcmask 130048   ;;  %v1945_v5 = vmov 0   ;;  %v219_v28 = vlaneseq  ;;  %v1946_v31 = vmov 0.0   ;;  %s2282_s0 = inlined_call_operand.vmem [shape: f32[232,32], index: 0, kind: input, shape index: {}]   ;;  %s2283_s2 = inlined_call_operand.vmem [shape: s32[64,1], index: 2, kind: input, shape index: {}]   ;;  %s2284_s1 = inlined_call_operand.vmem [shape: f32[40,32], index: 1, kind: input, shape index: {}]   ;;  %s2285_s3 = inlined_call_operand.vmem [shape: f32[25,32], index: 3, kind: output, shape index: {}]  }
   0x1   :  { %v16_v0 = vld [vmem:[%s2282_s0 + $0x10] sm:$0xff]  ;;  %v17_v1 = vld [vmem:[%s2282_s0 + $0x18] sm:$0xff]  ;;  %v14_v2 = vld [vmem:[%s2282_s0] sm:$0xff]  ;;  %1904 = vset.pattern.permute.xlu0 %v1945_v5  ;;  %1905 = vset.pattern.permute.xlu1 %v1945_v5  ;;  %vm269_vm2 = vcmask 261120   ;;  %v1947_v63 = vmov 0.0|0.0   ;;  %vm1948_vm10 = vmmov 0  }
   0x2   :  { %v1980_v3 = vpack.c.bf16 %v17_v1, %v16_v0  ;;  %1668 = vmatprep.mubr.msk.f32.mxu0 %vm50_vm0, %v14_v2  ;;  %1675 = vmatprep.mubr.msk.f32.mxu1 %vm50_vm0, %v14_v2  ;;  %v15_v4 = vld [vmem:[%s2282_s0 + $0x8] sm:$0xff]  ;;  %v211_v6 = vld [vmem:[%s2283_s2] sm:$0xff]  ;;  %v213_v8 = vld [vmem:[%s2283_s2 + $0x10] sm:$0xff]  ;;  %v2022_v29 = vand.u32 127, %v219_v28  ;;  %v400_v2 = vshrl.u32 %v219_v28, 7  ;;  %vm407_vm14 = vcmask 523264  }
   0x3   :  { %v212_v7 = vld [vmem:[%s2283_s2 + $0x8] sm:$0xff]  ;;  %v1528_v9 = vadd.s32 4294967295, %v211_v6  ;;  %v1530_v10 = vadd.s32 4294967295, %v213_v8  ;;  %v214_v11 = vld [vmem:[%s2283_s2 + $0x18] sm:$0xff]  ;;  %v2005_v12 = vld [vmem:[%s2284_s1 + $0x20] sm:$0xf] }
   0x4   :  { %1819 = vmatprep.subr.bf16.mxu0 %v1980_v3  ;;  %v1529_v13 = vadd.s32 4294967295, %v212_v7  ;;  %v1531_v14 = vadd.s32 4294967295, %v214_v11  ;;  %v481_v15 = vmax.f32 %v2005_v12, 1.0  ;;  %v215_v16 = vld [vmem:[%s2283_s2 + $0x20] sm:$0xff]  ;;  %v216_v17 = vld [vmem:[%s2283_s2 + $0x28] sm:$0xff]  ;;  %v217_v20 = vld [vmem:[%s2283_s2 + $0x30] sm:$0xff] }
   0x5   :  { %1821 = vmatpush3.bf16.msra.mxu0 %v1980_v3  ;;  %230 = vperm.xlu0 %1904, %v1528_v9   ;;  %v1532_v18 = vadd.s32 4294967295, %v215_v16  ;;  %v1533_v19 = vadd.s32 4294967295, %v216_v17  ;;  %v218_v21 = vld [vmem:[%s2283_s2 + $0x38] sm:$0xff]  ;;  %v1534_v22 = vadd.s32 4294967295, %v217_v20  ;;  %v26_v41 = vld [vmem:[%s2282_s0 + $0x60] sm:$0xff]  ;;  %v27_v42 = vld [vmem:[%s2282_s0 + $0x68] sm:$0xff] }
   0x6   :  { %236 = vperm.xlu1 %1905, %v1530_v10   ;;  %1907 = vrcp.f32 %v481_v15  ;;  %v1535_v23 = vadd.s32 4294967295, %v218_v21  ;;  %v1846_v45 = vpack.c.bf16 %v27_v42, %v26_v41  ;;  %v28_v46 = vld [vmem:[%s2282_s0 + $0x70] sm:$0xff]  ;;  %v29_v47 = vld [vmem:[%s2282_s0 + $0x78] sm:$0xff]  ;;  %v22_v60 = vld [vmem:[%s2282_s0 + $0x40] sm:$0xff]  ;;  %v401_v7 = vmul.u32 8, %v400_v2  ;;  %s1950_s2 = smov 124  }
   0x7   :  { %v1850_v50 = vpack.c.bf16 %v29_v47, %v28_v46  ;;  %v23_v61 = vld [vmem:[%s2282_s0 + $0x48] sm:$0xff]  ;;  %v18_v11 = vld [vmem:[%s2282_s0 + $0x20] sm:$0xff]  ;;  %v20_v17 = vld [vmem:[%s2282_s0 + $0x30] sm:$0xff] }
   0x8   :  { %1669 = vmatmul.mubr.msk.f32.vlgmr.msra.gmra.mrb[0].mxu0 %vm50_vm0, %v15_v4  ;;  %v1854_v62 = vpack.c.bf16 %v23_v61, %v22_v60  ;;  %v19_v15 = vld [vmem:[%s2282_s0 + $0x28] sm:$0xff]  ;;  %vm402_vm11 = vcmp.ge.s32.totalorder %v2022_v29, %v401_v7  ;;  %v21_v20 = vld [vmem:[%s2282_s0 + $0x38] sm:$0xff]  ;;  %v36_v42 = vld [vmem:[%s2282_s0 + $0xb0] sm:$0xff] }
   0x9   :  { %233 = vperm.xlu0 %1904, %v1529_v13   ;;  %v403_v13 = vadd.s32 8, %v401_v7 }
   0xa   :  { %239 = vperm.xlu1 %1905, %v1531_v14  }
   0xb   :  { %vm404_vm12 = vcmp.lt.s32.totalorder %v2022_v29, %v403_v13 }
   0xc   :  { %vm405_vm13 = vmand %vm402_vm11, %vm404_vm12 }
   0xd   :  { %242 = vperm.xlu0 %1904, %v1532_v18  }
   0xe   :  { %245 = vperm.xlu1 %1905, %v1533_v19  }
  0x10   :  { %v1908_v24 = vpop.eup %1907 }
  0x11   :  { %248 = vperm.xlu0 %1904, %v1534_v22  }
  0x12   :  { %251 = vperm.xlu1 %1905, %v1535_v23   ;;  %v2129_v23 = vsel %vm405_vm13, 1.0, %v1946_v31 }
  0x15   :  { %486 = vperm.xlu0 %1904, %v1908_v24   ;;  %v496_v24 = vmul.u32 8, %v2022_v29 }
  0x17   :  { %vm497_vm15 = vcmp.ge.s32.totalorder %v400_v2, %v496_v24 }
  0x84   :  { %v231_v30 = vpop.permute.xlu0 %230 }
  0x85   :  { %vm253_vm1 = vcmp.eq.s32.totalorder %v231_v30, %v2022_v29  ;;  %v237_v36 = vpop.permute.xlu1 %236  ;;  %v494_v30 = vadd.s32 16, %v400_v2 }
  0x86   :  { %v261_v32 = vsel %vm253_vm1, 1.0, %v1946_v31  ;;  %vm255_vm3 = vcmp.eq.s32.totalorder %v237_v36, %v2022_v29 }
  0x87   :  { %1686 = vmatprep.mubr.msk.f32.mxu0 %vm269_vm2, %v261_v32  ;;  %v263_v48 = vsel %vm255_vm3, 1.0, %v1946_v31  ;;  %v495_v32 = vadd.s32 24, %v400_v2 }
  0x88   :  { %v234_v43 = vpop.permute.xlu0 %233 }
  0x89   :  { %v240_v44 = vpop.permute.xlu1 %239  ;;  %vm254_vm4 = vcmp.eq.s32.totalorder %v234_v43, %v2022_v29  ;;  %vm500_vm11 = vcmp.ge.s32.totalorder %v495_v32, %v496_v24  ;;  %v37_v43 = vld [vmem:[%s2282_s0 + $0xb8] sm:$0xff] }
  0x8a   :  { %v262_v51 = vsel %vm254_vm4, 1.0, %v1946_v31  ;;  %vm256_vm5 = vcmp.eq.s32.totalorder %v240_v44, %v2022_v29 }
  0x8b   :  { %v264_v53 = vsel %vm256_vm5, 1.0, %v1946_v31  ;;  %vm514_vm5 = vcmask 31744  }
  0x8c   :  { %v243_v49 = vpop.permute.xlu0 %242 }
  0x8d   :  { %v246_v52 = vpop.permute.xlu1 %245  ;;  %vm257_vm6 = vcmp.eq.s32.totalorder %v243_v49, %v2022_v29  ;;  %v1866_v49 = vpack.c.bf16 %v37_v43, %v36_v42 }
  0x8e   :  { %v265_v54 = vsel %vm257_vm6, 1.0, %v1946_v31  ;;  %vm258_vm7 = vcmp.eq.s32.totalorder %v246_v52, %v2022_v29  ;;  %v31_v52 = vld [vmem:[%s2282_s0 + $0x88] sm:$0xff] }
  0x8f   :  { %v266_v57 = vsel %vm258_vm7, 1.0, %v1946_v31  ;;  %vm499_vm7 = vcmp.ge.s32.totalorder %v494_v30, %v496_v24 }
  0x90   :  { %v249_v55 = vpop.permute.xlu0 %248 }
  0x91   :  { %vm259_vm8 = vcmp.eq.s32.totalorder %v249_v55, %v2022_v29  ;;  %v252_v56 = vpop.permute.xlu1 %251  ;;  %v33_v55 = vld [vmem:[%s2282_s0 + $0x98] sm:$0xff] }
  0x92   :  { %v267_v58 = vsel %vm259_vm8, 1.0, %v1946_v31  ;;  %vm260_vm9 = vcmp.eq.s32.totalorder %v252_v56, %v2022_v29 }
  0x93   :  { %v268_v59 = vsel %vm260_vm9, 1.0, %v1946_v31 }
  0xdb   :  { %v1670_v25 = vpop.f32.mrb[0].mxu0 }
  0xdc   :  { %v123_v26 = vpop.f32.mrb[1].mxu0  ;;  %v133_v33 = vadd.f32 %v1670_v25, %v17_v1  ;;  %v25_v1 = vld [vmem:[%s2282_s0 + $0x58] sm:$0xff] }
  0xdd   :  { %v1822_v27 = vpack.c.bf16 %v1670_v25, %v123_v26  ;;  %v132_v34 = vadd.f32 %v123_v26, %v16_v0  ;;  %v24_v0 = vld [vmem:[%s2282_s0 + $0x50] sm:$0xff]  ;;  %v501_v25 = vadd.s32 8, %v496_v24  ;;  %v493_v26 = vadd.s32 8, %v400_v2 }
  0xde   :  { %v1858_v5 = vpack.c.bf16 %v25_v1, %v24_v0 }
  0xdf   :  { %1823 = vmatprep.subr.bf16.mxu1 %v1822_v27  ;;  %vm498_vm3 = vcmp.ge.s32.totalorder %v493_v26, %v496_v24  ;;  %vm503_vm4 = vcmp.lt.s32.totalorder %v493_v26, %v501_v25  ;;  %vm504_vm8 = vcmp.lt.s32.totalorder %v494_v30, %v501_v25  ;;  %vm505_vm12 = vcmp.lt.s32.totalorder %v495_v32, %v501_v25  ;;  %v1571_v32 = vld [vmem:[%s2282_s0 + $0xe1] ss:$0 sm:$0xff] }
  0xe0   :  { %1825 = vmatpush3.bf16.msra.mxu1 %v1822_v27  ;;  %vm2136_vm6 = vmand %vm498_vm3, %vm503_vm4 }
  0xe1   :  { %1834 = vmatprep.subr.bf16.mxu1 %v1947_v63  ;;  %vm2141_vm9 = vmand %vm499_vm7, %vm504_vm8  ;;  %v511_v47 = vsel %vm2136_vm6, 1.0, %v1946_v31 }
  0xe2   :  { %vm2145_vm13 = vmand %vm500_vm11, %vm505_vm12 }
  0xe3   :  { %1676 = vmatmul.mubr.msk.f32.vlgmr.msra.gmra.mrb[0].mxu1 %vm50_vm0, %v15_v4  ;;  %vm502_vm0 = vcmp.lt.s32.totalorder %v400_v2, %v501_v25  ;;  %v1949_v2 = vmov 1  }
  0xe4   :  { %1714 = vmatprep.mubr.msk.f32.mxu1 %vm1948_vm10, %v1946_v31  ;;  %vm506_vm1 = vmand %vm497_vm15, %vm502_vm0  ;;  %1906 = vset.pattern.permute.xlu0 %v1949_v2  ;;  %vm1477_vm15 = vcmask 257024  }
  0xe5   :  { %v510_v27 = vsel %vm506_vm1, 1.0, %v1946_v31 }
 0x1b6   :  { %v1677_v35 = vpop.f32.mrb[0].mxu1 }
 0x1b7   :  { %v210_v37 = vadd.f32 %v1677_v35, %v133_v33  ;;  %v200_v38 = vpop.f32.mrb[1].mxu1 }
 0x1b8   :  { %v209_v39 = vadd.f32 %v200_v38, %v132_v34  ;;  %v34_v38 = vld [vmem:[%s2282_s0 + $0xa0] sm:$0xff] }
 0x1b9   :  { %1514 = vst.msk [vmem:[%s2285_s3 + $0x8] sm:$0xff] %vm269_vm2, %v210_v37 }
 0x1ba   :  { %v1826_v40 = vpack.c.bf16 %v210_v37, %v209_v39  ;;  %1513 = vst.msk [vmem:[%s2285_s3] sm:$0xff] %vm269_vm2, %v209_v39  ;;  %v35_v39 = vld [vmem:[%s2282_s0 + $0xa8] sm:$0xff] }
 0x1bb   :  { %v1862_v46 = vpack.c.bf16 %v35_v39, %v34_v38 }
 0x1bc   :  { %1827 = vmatprep.subr.bf16.mxu0 %v1826_v40 }
 0x1bd   :  { %1829 = vmatpush3.bf16.msra.mxu0 %v1826_v40  ;;  %v2155_v40 = vpop.permute.xlu0 %486 }
 0x1be   :  { %1831 = vmatprep.subr.bf16.mxu0 %v1980_v3 }
 0x1c1   :  { %1833 = vmatpush3.bf16.msra.mxu0 %v1980_v3 }
 0x1c2   :  { %1847 = vmatprep.subr.bf16.mxu0 %v1846_v45 }
 0x1c4   :  { %1687 = vmatmul.mubr.msk.f32.vlgmr.msra.gmra.mrb[2].mxu0 %vm269_vm2, %v262_v51  ;;  %v30_v51 = vld [vmem:[%s2282_s0 + $0x80] sm:$0xff] }
 0x1c5   :  { %1689 = vmatprep.mubr.msk.f32.mxu0 %vm269_vm2, %v263_v48  ;;  %1849 = vmatpush3.bf16.msra.mxu0 %v1846_v45  ;;  %v512_v48 = vsel %vm2141_vm9, 1.0, %v1946_v31 }
 0x1c6   :  { %1851 = vmatprep.subr.bf16.mxu0 %v1850_v50 }
 0x1c8   :  { %1690 = vmatmul.mubr.msk.f32.gmra.mrb[4].mxu0 %vm269_vm2, %v264_v53  ;;  %v1870_v53 = vpack.c.bf16 %v31_v52, %v30_v51  ;;  %v47_v52 = vld [vmem:[%s2284_s1 + $0x10] sm:$0xff] }
 0x1c9   :  { %1692 = vmatprep.mubr.msk.f32.mxu0 %vm269_vm2, %v265_v54  ;;  %1853 = vmatpush3.bf16.msra.mxu0 %v1850_v50  ;;  %v513_v50 = vsel %vm2145_vm13, 1.0, %v1946_v31  ;;  %v32_v54 = vld [vmem:[%s2282_s0 + $0x90] sm:$0xff] }
 0x1ca   :  { %1855 = vmatprep.subr.bf16.mxu0 %v1854_v62 }
 0x1cc   :  { %1693 = vmatmul.mubr.msk.f32.gmra.mrb[6].mxu0 %vm269_vm2, %v266_v57 }
 0x1cd   :  { %1695 = vmatprep.mubr.msk.f32.mxu0 %vm269_vm2, %v267_v58  ;;  %v1874_v58 = vpack.c.bf16 %v33_v55, %v32_v54  ;;  %v48_v55 = vld [vmem:[%s2284_s1 + $0x18] sm:$0xff] }
 0x1d0   :  { %1696 = vmatmul.mubr.msk.f32.gmra.mrb[8].mxu0 %vm269_vm2, %v268_v59 }
 0x297   :  { %v2086_v3 = vpop.f32.mrb[2].mxu0 }
 0x298   :  { %v2088_v4 = vpop.f32.mrb[3].mxu0 }
 0x299   :  { %v1835_v6 = vpack.c.bf16 %v2086_v3, %v2088_v4  ;;  %1733 = vmatprep.mubr.msk.f32.mxu0 %vm269_vm2, %v2088_v4 }
 0x29a   :  { %1734 = vmatmul.mubr.msk.f32.vlgmr.msra.gmra.mrb[10].mxu0 %vm269_vm2, %v2086_v3 }
 0x29b   :  { %v2096_v8 = vpop.f32.mrb[4].mxu0  ;;  %1836 = vmatpush3.bf16.msra.mxu1 %v1835_v6  ;;  %1857 = vmatpush3.bf16.msra.mxu0 %v1854_v62 }
 0x29c   :  { %v2098_v9 = vpop.f32.mrb[5].mxu0  ;;  %1837 = vmatprep.subr.bf16.mxu1 %v1947_v63  ;;  %1859 = vmatprep.subr.bf16.mxu0 %v1858_v5 }
 0x29d   :  { %v1838_v10 = vpack.c.bf16 %v2096_v8, %v2098_v9  ;;  %1736 = vmatprep.mubr.msk.f32.mxu0 %vm269_vm2, %v2098_v9 }
 0x29e   :  { %1737 = vmatmul.mubr.msk.f32.gmra.mrb[12].mxu0 %vm269_vm2, %v2096_v8 }
 0x29f   :  { %v1694_v14 = vpop.f32.mrb[6].mxu0  ;;  %1839 = vmatpush3.bf16.msra.mxu1 %v1838_v10  ;;  %1861 = vmatpush3.bf16.msra.mxu0 %v1858_v5  ;;  %v1566_v5 = vld [vmem:[%s2282_s0 + $0xe0] ss:$0 sm:$0xff] }
 0x2a0   :  { %v380_v16 = vpop.f32.mrb[7].mxu0  ;;  %1747 = vmatprep.mubr.msk.f32.mxu0 %vm269_vm2, %v18_v11  ;;  %1840 = vmatprep.subr.bf16.mxu1 %v1947_v63 }
 0x2a1   :  { %v1841_v18 = vpack.c.bf16 %v1694_v14, %v380_v16  ;;  %1878 = vmatprep.subr.bf16.mxu0 %v1947_v63 }
 0x2a2   :  { %1748 = vmatmul.mubr.msk.f32.vlgmr.msra.gmra.mrb[10].mxu0 %vm269_vm2, %v19_v15 }
 0x2a3   :  { %v1697_v19 = vpop.f32.mrb[8].mxu0  ;;  %1842 = vmatpush3.bf16.msra.mxu1 %v1841_v18  ;;  %1750 = vmatprep.mubr.msk.f32.mxu0 %vm269_vm2, %v20_v17 }
 0x2a4   :  { %v390_v21 = vpop.f32.mrb[9].mxu0  ;;  %1843 = vmatprep.subr.bf16.mxu1 %v1947_v63 }
 0x2a5   :  { %v1844_v22 = vpack.c.bf16 %v1697_v19, %v390_v21 }
 0x2a6   :  { %1751 = vmatmul.mubr.msk.f32.gmra.mrb[12].mxu0 %vm269_vm2, %v21_v20 }
 0x2a7   :  { %1845 = vmatpush3.bf16.msra.mxu1 %v1844_v22  ;;  %1789 = vmatprep.mubr.msk.f32.mxu0 %vm1948_vm10, %v1946_v31 }
 0x2aa   :  { %1715 = vmatmul.mubr.msk.f32.vlgmr.msra.gmra.mrb[2].mxu1 %vm407_vm14, %v2129_v23  ;;  %vm527_vm14 = vcmask 1043456  }
 0x2ab   :  { %1719 = vmatprep.mubr.msk.f32.mxu1 %vm514_vm5, %v510_v27 }
 0x375   :  { %v1749_v34 = vpop.f32.mrb[10].mxu0 }
 0x376   :  { %v791_v35 = vpop.f32.mrb[11].mxu0 }
 0x377   :  { %1909 = vtanh.f32 %v791_v35 }
 0x378   :  { %1911 = vtanh.f32 %v1749_v34 }
 0x379   :  { %v1752_v36 = vpop.f32.mrb[12].mxu0 }
 0x37a   :  { %v801_v37 = vpop.f32.mrb[13].mxu0 }
 0x37b   :  { %1913 = vtanh.f32 %v801_v37 }
 0x37c   :  { %1915 = vtanh.f32 %v1752_v36 }
 0x37d   :  { %v2157_v41 = vpop.f32.mrb[2].mxu1 }
 0x37e   :  { %v489_v44 = vmul.f32 %v2155_v40, %v2157_v41  ;;  %v1716_v45 = vpop.f32.mrb[3].mxu1 }
 0x380   :  { %1717 = vmatprep.subr.msk.mxu1 %vm527_vm14, %v489_v44 }
 0x381   :  { %1718 = vmatpush3.msk.msra.mxu1 %vm527_vm14, %v489_v44  ;;  %v1910_v61 = vpop.eup %1909 }
 0x382   :  { %1720 = vmatmul.mubr.msk.f32.vlgmr.msra.gmra.mrb[4].mxu1 %vm514_vm5, %v511_v47  ;;  %1863 = vmatprep.subr.bf16.mxu1 %v1862_v46  ;;  %v1912_v62 = vpop.eup %1911 }
 0x383   :  { %1722 = vmatprep.mubr.msk.f32.mxu1 %vm514_vm5, %v512_v48  ;;  %1865 = vmatpush3.bf16.msra.mxu1 %v1862_v46  ;;  %v46_v46 = vld [vmem:[%s2284_s1 + $0x8] sm:$0xff] }
 0x384   :  { %1867 = vmatprep.subr.bf16.mxu1 %v1866_v49 }
 0x385   :  { %v1914_v0 = vpop.eup %1913 }
 0x386   :  { %1723 = vmatmul.mubr.msk.f32.gmra.mrb[6].mxu1 %vm514_vm5, %v513_v50  ;;  %v1916_v1 = vpop.eup %1915 }
 0x387   :  { %1869 = vmatpush3.bf16.msra.mxu1 %v1866_v49  ;;  %v45_v49 = vld [vmem:[%s2284_s1] sm:$0xff] }
 0x388   :  { %1871 = vmatprep.subr.bf16.mxu1 %v1870_v53 }
 0x455   :  { %v1721_v56 = vpop.f32.mrb[4].mxu1 }
 0x456   :  { %v597_v57 = vpop.f32.mrb[5].mxu1 }
 0x457   :  { %1761 = vmatprep.mubr.msk.f32.mxu1 %vm269_vm2, %v597_v57 }
 0x458   :  { %1762 = vmatmul.mubr.msk.f32.vlgmr.msra.gmra.mrb[8].mxu1 %vm269_vm2, %v1721_v56 }
 0x459   :  { %v1724_v59 = vpop.f32.mrb[6].mxu1  ;;  %1873 = vmatpush3.bf16.msra.mxu1 %v1870_v53 }
 0x45a   :  { %v607_v60 = vpop.f32.mrb[7].mxu1  ;;  %1875 = vmatprep.subr.bf16.mxu1 %v1874_v58 }
 0x45b   :  { %1764 = vmatprep.mubr.msk.f32.mxu1 %vm269_vm2, %v607_v60 }
 0x45c   :  { %1765 = vmatmul.mubr.msk.f32.gmra.mrb[10].mxu1 %vm269_vm2, %v1724_v59 }
 0x45d   :  { %1877 = vmatpush3.bf16.msra.mxu1 %v1874_v58  ;;  %1775 = vmatprep.mubr.msk.f32.mxu1 %vm269_vm2, %v1910_v61 }
 0x45e   :  { %1797 = vmatprep.subr.mxu1 %v1946_v31 }
 0x460   :  { %1776 = vmatmul.mubr.msk.f32.vlgmr.msra.gmra.mrb[8].mxu1 %vm269_vm2, %v1912_v62 }
 0x461   :  { %1778 = vmatprep.mubr.msk.f32.mxu1 %vm269_vm2, %v1914_v0 }
 0x464   :  { %1779 = vmatmul.mubr.msk.f32.gmra.mrb[10].mxu1 %vm269_vm2, %v1916_v1 }
 0x465   :  { %1799 = vmatprep.mubr.msk.f32.mxu1 %vm1948_vm10, %v1946_v31 }
 0x533   :  { %v1777_v6 = vpop.f32.mrb[8].mxu1 }
 0x534   :  { %v1013_v7 = vadd.f32 %v1777_v6, %v1566_v5  ;;  %v989_v10 = vpop.f32.mrb[9].mxu1  ;;  %v490_v6 = vrot.slane %v2155_v40, 4 }
 0x535   :  { %v1012_v11 = vadd.f32 %v1566_v5, %v989_v10 }
 0x536   :  { %v1568_v13 = vmul.f32 -1.442695, %v1013_v7  ;;  %v492_v10 = vmul.f32 %v490_v6, %v2157_v41  ;;  %v38_v41 = vld [vmem:[%s2282_s0 + $0xc0] sm:$0xff] }
 0x537   :  { %v1567_v14 = vmul.f32 -1.442695, %v1012_v11  ;;  %v1780_v15 = vpop.f32.mrb[10].mxu1 }
 0x538   :  { %1917 = vpow2.f32 %v1568_v13  ;;  %v1015_v16 = vadd.f32 %v1780_v15, %v1566_v5  ;;  %v999_v17 = vpop.f32.mrb[11].mxu1  ;;  %v39_v13 = vld [vmem:[%s2282_s0 + $0xc8] sm:$0xff]  ;;  %v40_v15 = vld [vmem:[%s2282_s0 + $0xd0] sm:$0xff] }
 0x539   :  { %1919 = vpow2.f32 %v1567_v14  ;;  %v1014_v18 = vadd.f32 %v1566_v5, %v999_v17  ;;  %v1885_v14 = vpack.c.bf16 %v39_v13, %v38_v41  ;;  %v44_v17 = vld [vmem:[%s2282_s0 + $0xe2] sm:$0xf] }
 0x53a   :  { %v1570_v19 = vmul.f32 -1.442695, %v1015_v16 }
 0x53b   :  { %v1569_v20 = vmul.f32 -1.442695, %v1014_v18 }
 0x53c   :  { %1921 = vpow2.f32 %v1570_v19 }
 0x53d   :  { %1923 = vpow2.f32 %v1569_v20 }
 0x542   :  { %v1918_v21 = vpop.eup %1917 }
 0x543   :  { %v1920_v22 = vpop.eup %1919  ;;  %v1029_v24 = vadd.f32 1.0, %v1918_v21 }
 0x544   :  { %v1028_v25 = vadd.f32 1.0, %v1920_v22 }
 0x545   :  { %1925 = vrcp.f32 %v1029_v24 }
 0x546   :  { %v1922_v26 = vpop.eup %1921  ;;  %1927 = vrcp.f32 %v1028_v25 }
 0x547   :  { %v1924_v27 = vpop.eup %1923  ;;  %v1031_v28 = vadd.f32 1.0, %v1922_v26 }
 0x548   :  { %v1030_v30 = vadd.f32 1.0, %v1924_v27 }
 0x549   :  { %1929 = vrcp.f32 %v1031_v28 }
 0x54a   :  { %1931 = vrcp.f32 %v1030_v30 }
 0x54f   :  { %v1926_v29 = vpop.eup %1925 }
 0x550   :  { %v1928_v33 = vpop.eup %1927  ;;  %v1045_v34 = vmul.f32 %v1926_v29, %v1571_v32 }
 0x551   :  { %v1044_v35 = vmul.f32 %v1928_v33, %v1571_v32 }
 0x552   :  { %v1051_v36 = vsel %vm269_vm2, %v1045_v34, 0.0 }
 0x553   :  { %v1930_v37 = vpop.eup %1929  ;;  %1052 = vadd.xlane.f32.xlu0 %v1051_v36  ;;  %v1048_v38 = vsel %vm269_vm2, %v1044_v35, 0.0 }
 0x554   :  { %v1932_v39 = vpop.eup %1931  ;;  %1049 = vadd.xlane.f32.xlu1 %v1048_v38  ;;  %v1047_v42 = vmul.f32 %v1930_v37, %v1571_v32 }
 0x555   :  { %v1046_v43 = vmul.f32 %v1932_v39, %v1571_v32 }
 0x556   :  { %v1057_v44 = vsel %vm269_vm2, %v1047_v42, 0.0 }
 0x557   :  { %v1054_v45 = vsel %vm269_vm2, %v1046_v43, 0.0 }
 0x558   :  { %1058 = vadd.xlane.f32.xlu1 %v1057_v44  ;;  %1055 = vadd.xlane.f32.xlu0 %v1054_v45 }
 0x56e   :  { %1162 = vperm.xlu0 %1906, %v2005_v12  }
 0x5e0   :  { %v1053_v47 = vpop.xlane.xlu0 %1052 }
 0x5e1   :  { %v1061_v48 = vmul.f32 %v1053_v47, %v46_v46  ;;  %v1050_v50 = vpop.xlane.xlu1 %1049 }
 0x5e2   :  { %v1060_v51 = vmul.f32 %v1050_v50, %v45_v49 }
 0x5e3   :  { %1071 = vperm.xlu1 %1905, %v1061_v48  }
 0x5e5   :  { %v1056_v53 = vpop.xlane.xlu0 %1055  ;;  %v1059_v56 = vpop.xlane.xlu1 %1058 }
 0x5e6   :  { %v1062_v54 = vmul.f32 %v1056_v53, %v47_v52  ;;  %v1063_v57 = vmul.f32 %v1059_v56, %v48_v55 }
 0x5e7   :  { %1066 = vperm.xlu1 %1905, %v1060_v51  }
 0x5eb   :  { %1076 = vperm.xlu1 %1905, %v1062_v54  }
 0x5ed   :  { %v1163_v58 = vpop.permute.xlu0 %1162 }
 0x5ee   :  { %v1165_v59 = vmul.f32 %v1163_v58, %v2005_v12 }
 0x5ef   :  { %1081 = vperm.xlu1 %1905, %v1063_v57  }
 0x5f3   :  { %1167 = vrot.lane.b32.xlu1 %v1165_v59, %s1950_s2 }
 0x662   :  { %v1072_v60 = vpop.permute.xlu1 %1071 }
 0x663   :  { %v1085_v62 = vmul.f32 %v2086_v3, %v1072_v60  ;;  %v1170_v3 = vrot.slane %v492_v10, 4 }
 0x666   :  { %v1067_v61 = vpop.permute.xlu1 %1066 }
 0x667   :  { %v1084_v0 = vmul.f32 %v1067_v61, %v2088_v4 }
 0x669   :  { %v1879_v1 = vpack.c.bf16 %v1085_v62, %v1084_v0 }
 0x66a   :  { %v1077_v2 = vpop.permute.xlu1 %1076 }
 0x66b   :  { %1880 = vmatpush3.bf16.msra.mxu0 %v1879_v1  ;;  %v1086_v7 = vmul.f32 %v1077_v2, %v2098_v9 }
 0x66c   :  { %1881 = vmatprep.subr.bf16.mxu0 %v1947_v63 }
 0x66e   :  { %v1082_v5 = vpop.permute.xlu1 %1081 }
 0x66f   :  { %v1087_v12 = vmul.f32 %v2096_v8, %v1082_v5 }
 0x671   :  { %v1882_v11 = vpack.c.bf16 %v1087_v12, %v1086_v7 }
 0x672   :  { %v1168_v4 = vpop.permute.xlu1 %1167 }
 0x673   :  { %1883 = vmatpush3.bf16.msra.mxu0 %v1882_v11 }
 0x674   :  { %1792 = vmatprep.subr.mxu0 %v1946_v31 }
 0x676   :  { %1790 = vmatmul.mubr.msk.f32.vlgmr.msra.gmra.mrb[14].mxu0 %vm269_vm2, %v2129_v23 }
 0x677   :  { %1793 = vmatpush3.msk.msra.mxu0 %vm527_vm14, %v1170_v3  ;;  %1794 = vmatprep.mubr.msk.f32.mxu0 %vm1948_vm10, %v1946_v31 }
 0x678   :  { %1802 = vmatprep.subr.mxu0 %v1946_v31 }
 0x67a   :  { %1795 = vmatmul.mubr.msk.f32.vlgmr.msra.gmra.mrb[16].mxu0 %vm514_vm5, %v1168_v4 }
 0x67b   :  { %1804 = vmatprep.mubr.msk.f32.mxu0 %vm1948_vm10, %v1946_v31 }
 0x749   :  { %v1156_v8 = vpop.f32.mrb[14].mxu0 }
 0x74a   :  { %v1791_v9 = vpop.f32.mrb[15].mxu0  ;;  %1803 = vmatpush3.msk.msra.mxu0 %vm527_vm14, %v1156_v8  ;;  %1515 = vst.msk [vmem:[%s2285_s3 + $0x10] sm:$0xf] %vm1477_vm15, %v1156_v8 }
 0x74b   :  { %1805 = vmatmul.mubr.msk.f32.vlgmr.msra.gmra.mrb[18].mxu0 %vm514_vm5, %v44_v17 }
 0x74d   :  { %v1241_v23 = vpop.f32.mrb[16].mxu0 }
 0x74e   :  { %v1796_v40 = vpop.f32.mrb[17].mxu0  ;;  %1798 = vmatpush3.msk.msra.mxu1 %vm527_vm14, %v1241_v23  ;;  %v1246_v18 = vrot.slane %v1241_v23, 4 }
 0x74f   :  { %1800 = vmatmul.mubr.msk.f32.vlgmr.msra.gmra.mrb[12].mxu1 %vm514_vm5, %v1168_v4  ;;  %1884 = vmatprep.subr.bf16.mxu1 %v1947_v63 }
 0x750   :  { %1815 = vmatprep.mubr.msk.f32.mxu1 %vm1948_vm10, %v1946_v31  ;;  %1886 = vmatpush3.bf16.msra.mxu1 %v1885_v14  ;;  %v41_v31 = vld [vmem:[%s2282_s0 + $0xd8] sm:$0xff]  ;;  %v1248_v20 = vadd.f32 %v1246_v18, %v492_v10  ;;  %vm1516_vm10 = vcmask 261124  }
 0x751   :  { %1887 = vmatprep.subr.bf16.mxu1 %v1947_v63  ;;  %v1888_v16 = vpack.c.bf16 %v41_v31, %v40_v15 }
 0x754   :  { %1889 = vmatpush3.bf16.msra.mxu1 %v1888_v16 }
 0x81e   :  { %v1397_v27 = vpop.f32.mrb[18].mxu0 }
 0x81f   :  { %v1806_v28 = vpop.f32.mrb[19].mxu0 }
 0x822   :  { %v1317_v19 = vpop.f32.mrb[12].mxu1 }
 0x823   :  { %v1322_v63 = vrot.slane %v1317_v19, 4  ;;  %v1801_v21 = vpop.f32.mrb[13].mxu1 }
 0x825   :  { %v1324_v22 = vadd.f32 %v1322_v63, %v1248_v20 }
 0x827   :  { %v1402_v24 = vrot.slane %v1324_v22, 4  ;;  %1517 = vst.msk [vmem:[%s2285_s3 + $0x10] sm:$0xf0] %vm1516_vm10, %v1324_v22 }
 0x829   :  { %1816 = vmatmul.mubr.msk.f32.vlgmr.msra.gmra.mrb[14].mxu1 %vm269_vm2, %v1402_v24  ;;  %v1476_v25 = vmul.f32 %v1402_v24, %v1156_v8  ;;  %vm1518_vm2 = vcmask 253952  }
 0x82b   :  { %v1478_v26 = vsel %vm1477_vm15, %v1476_v25, 0.0 }
 0x82c   :  { %1479 = vadd.xlane.f32.xlu1 %v1478_v26 }
 0x8b9   :  { %v1480_v34 = vpop.xlane.xlu1 %1479 }
 0x8ba   :  { %v1580_v35 = vmul.f32 -1.442695, %v1480_v34 }
 0x8bc   :  { %1933 = vpow2.f32 %v1580_v35 }
 0x8c6   :  { %v1934_v37 = vpop.eup %1933 }
 0x8c7   :  { %v1488_v39 = vadd.f32 1.0, %v1934_v37 }
 0x8fc   :  { %v1471_v30 = vpop.f32.mrb[14].mxu1 }
 0x8fd   :  { %v1481_v32 = vmul.f32 %v1471_v30, %v1397_v27  ;;  %v1817_v29 = vpop.f32.mrb[15].mxu1 }
 0x8ff   :  { %v1482_v33 = vsel %vm1477_vm15, %v1481_v32, 0.0 }
 0x900   :  { %1483 = vadd.xlane.f32.xlu0 %v1482_v33 }
 0x98d   :  { %v1484_v36 = vpop.xlane.xlu0 %1483 }
 0x98e   :  { %v1581_v38 = vmul.f32 -1.442695, %v1484_v36 }
 0x990   :  { %1935 = vpow2.f32 %v1581_v38 }
 0x991   :  { %1937 = vrcp.f32 %v1488_v39 }
 0x99a   :  { %v1936_v42 = vpop.eup %1935 }
 0x99b   :  { %v1498_v43 = vadd.f32 1.0, %v1936_v42  ;;  %v1938_v44 = vpop.eup %1937 }
 0x99c   :  { %v1491_v45 = vadd.f32 1e-08, %v1938_v44 }
 0x99d   :  { %1939 = vrcp.f32 %v1498_v43 }
 0x99e   :  { %1941 = vlog2.f32 %v1491_v45 }
 0x9a7   :  { %v1940_v46 = vpop.eup %1939 }
 0x9a8   :  { %v1501_v47 = vsub.f32 1.0, %v1940_v46  ;;  %v1942_v49 = vpop.eup %1941 }
 0x9a9   :  { %v1493_v50 = vmul.f32 0.6931472, %v1942_v49 }
 0x9aa   :  { %v1502_v48 = vadd.f32 1e-08, %v1501_v47 }
 0x9ab   :  { %v1494_v52 = vsub.f32 0.0, %v1493_v50 }
 0x9ac   :  { %1943 = vlog2.f32 %v1502_v48 }
 0x9b6   :  { %v1944_v51 = vpop.eup %1943 }
 0x9b7   :  { %v1504_v53 = vmul.f32 0.6931472, %v1944_v51 }
 0x9b9   :  { %v1505_v54 = vsub.f32 %v1494_v52, %v1504_v53 }
 0x9bb   :  { %v1506_v55 = vsel %vm527_vm14, %v1505_v54, 0.0 }
 0x9bc   :  { %v1507_v56 = vrot.slane %v1506_v55, 4 }
 0x9be   :  { %v1508_v57 = vadd.f32 %v1507_v56, %v1506_v55 }
 0x9c0   :  { %v1509_v58 = vrot.slane %v1508_v57, 2 }
 0x9c2   :  { %v1510_v59 = vadd.f32 %v1509_v58, %v1508_v57 }
 0x9c4   :  { %v1511_v60 = vrot.slane %v1510_v59, 1 }
 0x9c6   :  { %v1512_v61 = vadd.f32 %v1511_v60, %v1510_v59 }
 0x9c8   :  { %1519 = vst.msk [vmem:[%s2285_s3 + $0x18] sm:$0x1] %vm1518_vm2, %v1512_v61 }

</bundles_post_ra>
